<compile_context>
chip_gen: v7x
topology: tpu7x:2x2x1
jax: 0.10.0
libtpu: 0.0.40
codegen_flags: <defaults>
</compile_context>

<pallas_src>
import jax
import jax.numpy as jnp
from jax import lax
from jax.experimental import pallas as pl
from jax.experimental.pallas import tpu as pltpu


def _round_up(a, m):
    return ((a + m - 1) // m) * m


def mlp_kernel(alpha_ref, b3_ref,                      # SMEM (1,1) scalars
               x_ref, w1_ref, b1_ref, w2_ref, b2_ref, w3_ref,
               o_ref):
    # x_ref: [TB, 50] batch-major tile, straight from HBM (no wrapper relayout).
    # fc1 + ReLU: W1 [32,50] contracted with X [TB,50] over the feature axis of
    # both operands ("NT" matmul) -> feature-major [32, TB]; the relayout of x
    # is handled inside the dot (XLU/MXU slots, hidden under the x DMA).
    a1 = lax.dot_general(
        w1_ref[...], x_ref[...],
        dimension_numbers=(((1,), (1,)), ((), ())),
        preferred_element_type=jnp.float32) + b1_ref[...]
    h1 = jnp.maximum(a1, 0.0)                          # [32, TB]

    # Dropout: inference mode -> identity.
    # TODO(synk): training-mode dropout (torch RNG stream) has no Pallas parity.
    dout = h1

    # fc2 + PReLU (single shared alpha, read from SMEM on the scalar path).
    a2 = jnp.dot(w2_ref[...], dout,
                 preferred_element_type=jnp.float32) + b2_ref[...]
    alpha = alpha_ref[0, 0]
    h2 = jnp.where(a2 > 0, a2, alpha * a2)             # [16, TB]

    # out (+ Sigmoid): [16]->[1] projection as VPU multiply + sublane reduce
    # (avoids an N=1 MXU matmul, keeps the output lane-dense [1, TB]).
    a3 = jnp.sum(w3_ref[...] * h2, axis=0, keepdims=True) + b3_ref[0, 0]
    o_ref[...] = jax.nn.sigmoid(a3)                    # [1, TB]


def net_forward(x, params, block_b=4096):
    """x: [B, 50] float32 -> [B, 1] float32 (matches PyTorch Net.forward, eval mode)."""
    w1, b1, w2, b2, w3, b3, alpha = params
    B, IN = x.shape

    # Lane-align the requested batch tile (a non-multiple-of-128 tile with a
    # multi-block grid would violate the (8,128) BlockSpec constraint).
    block_b = max(128, (int(block_b) // 128) * 128)

    if B > block_b:
        TB = block_b                                    # many full-size tiles
    elif B >= 2048:
        # Whole batch fits in one tile, but keep >=2 grid steps so the
        # "parallel" axis can still shard across v7x's two TensorCores.
        TB = _round_up(pl.cdiv(B, 2), 128)
    else:
        TB = B                                          # one exact block, no padding
    nb = pl.cdiv(B, TB)
    Bp = nb * TB

    vmem = pltpu.MemorySpace.VMEM
    smem = pltpu.MemorySpace.SMEM
    const = lambda a: pl.BlockSpec(a.shape, lambda i: (0, 0), memory_space=vmem)

    out = pl.pallas_call(
        mlp_kernel,
        out_shape=jax.ShapeDtypeStruct((1, Bp), jnp.float32),
        grid=(nb,),
        in_specs=[
            pl.BlockSpec(memory_space=smem),                              # alpha (1,1)
            pl.BlockSpec(memory_space=smem),                              # b3    (1,1)
            pl.BlockSpec((TB, IN), lambda i: (i, 0), memory_space=vmem),  # x stream
            const(w1), const(b1), const(w2), const(b2), const(w3),        # resident
        ],
        out_specs=pl.BlockSpec((1, TB), lambda i: (0, i), memory_space=vmem),
        compiler_params=pltpu.CompilerParams(
            dimension_semantics=("parallel",)),
    )(alpha, b3, x, w1, b1, w2, b2, w3)

    return out[0, :B][:, None]                                            # [B, 1]


def init_params(key, in_dim=50, fc1_size=32, fc2_size=16):
    """Deterministic PyTorch-Linear-style uniform(-1/sqrt(fan_in), ...) init.

    Weights stored [out, in] (PyTorch layout), biases as [out, 1] columns,
    matching the feature-major kernel math.  w3 is stored [fc2_size, 1] for the
    VPU multiply + sublane reduce; b3 stays (1,1) and is read from SMEM.
    """
    ks = jax.random.split(key, 6)

    def lin(kw, kb, fan_in, fan_out):
        bound = 1.0 / jnp.sqrt(fan_in)
        w = jax.random.uniform(kw, (fan_out, fan_in), jnp.float32, -bound, bound)
        b = jax.random.uniform(kb, (fan_out, 1), jnp.float32, -bound, bound)
        return w, b

    w1, b1 = lin(ks[0], ks[1], in_dim, fc1_size)
    w2, b2 = lin(ks[2], ks[3], fc1_size, fc2_size)
    w3t, b3 = lin(ks[4], ks[5], fc2_size, 1)
    w3 = w3t.T                                   # [fc2_size, 1]
    alpha = jnp.full((1, 1), 0.25, jnp.float32)  # nn.PReLU(1) default init
    return (w1, b1, w2, b2, w3, b3, alpha)


def reference_forward(x, params):
    w1, b1, w2, b2, w3, b3, alpha = params
    hp = lax.Precision.HIGHEST
    h1 = jnp.maximum(jnp.dot(x, w1.T, precision=hp) + b1.T, 0.0)
    a2 = jnp.dot(h1, w2.T, precision=hp) + b2.T
    h2 = jnp.where(a2 > 0, a2, alpha[0, 0] * a2)
    return jax.nn.sigmoid(jnp.dot(h2, w3, precision=hp) + b3)


if __name__ == "__main__":
    key = jax.random.PRNGKey(0)
    kx, kx2, kp = jax.random.split(key, 3)

    B, IN, FC1, FC2 = 8, 50, 32, 16
    params = init_params(kp, IN, FC1, FC2)

    # Small batch (single exact block).
    x = jax.random.normal(kx, (B, IN), jnp.float32)
    y = net_forward(x, params)
    jax.block_until_ready(y)
    y_ref = reference_forward(x, params)
    assert y.shape == (B, 1)
    assert jnp.allclose(y, y_ref, atol=1e-5, rtol=1e-5)

    # Multi-block grid with a ragged last block (300 = 2*128 + 44 rows).
    B2 = 300
    x2 = jax.random.normal(kx2, (B2, IN), jnp.float32)
    y2 = net_forward(x2, params, block_b=128)     # grid = 3 batch blocks
    jax.block_until_ready(y2)
    y2_ref = reference_forward(x2, params)
    assert y2.shape == (B2, 1)
    assert jnp.allclose(y2, y2_ref, atol=1e-5, rtol=1e-5)

    print("KERNEL_OK")
</pallas_src>

<mosaic_0001>
module attributes {stable_mosaic.version = 11 : i64} {
  func.func @mlp_kernel(%arg0: i32, %arg1: memref<1x1xf32, #tpu.memory_space<smem>>, %arg2: memref<1x1xf32, #tpu.memory_space<smem>>, %arg3: memref<8x50xf32, #tpu.memory_space<vmem>>, %arg4: memref<32x50xf32, #tpu.memory_space<vmem>>, %arg5: memref<32x1xf32, #tpu.memory_space<vmem>>, %arg6: memref<16x32xf32, #tpu.memory_space<vmem>>, %arg7: memref<16x1xf32, #tpu.memory_space<vmem>>, %arg8: memref<16x1xf32, #tpu.memory_space<vmem>>, %arg9: memref<1x8xf32, #tpu.memory_space<vmem>>) attributes {dimension_semantics = [#tpu.dimension_semantics<parallel>], iteration_bounds = array<i64: 1>, scalar_prefetch = 0 : i64, scratch_operands = 0 : i64, tpu.core_type = #tpu.core_type<tc>, window_params = [{transform_indices = @transform_0, window_bounds = array<i64: 1, 1>}, {transform_indices = @transform_1, window_bounds = array<i64: 1, 1>}, {transform_indices = @transform_2, window_bounds = array<i64: 8, 50>}, {pipeline_mode = #tpu.pipeline_mode<synchronous>, transform_indices = @transform_3, window_bounds = array<i64: 32, 50>}, {pipeline_mode = #tpu.pipeline_mode<synchronous>, transform_indices = @transform_4, window_bounds = array<i64: 32, 1>}, {pipeline_mode = #tpu.pipeline_mode<synchronous>, transform_indices = @transform_5, window_bounds = array<i64: 16, 32>}, {pipeline_mode = #tpu.pipeline_mode<synchronous>, transform_indices = @transform_6, window_bounds = array<i64: 16, 1>}, {pipeline_mode = #tpu.pipeline_mode<synchronous>, transform_indices = @transform_7, window_bounds = array<i64: 16, 1>}, {transform_indices = @transform_8, window_bounds = array<i64: 1, 8>}]} {
    %c0 = arith.constant 0 : index
    %c0_0 = arith.constant 0 : index
    %0 = vector.load %arg4[%c0, %c0_0] : memref<32x50xf32, #tpu.memory_space<vmem>>, vector<32x50xf32>
    %c0_1 = arith.constant 0 : index
    %c0_2 = arith.constant 0 : index
    %1 = vector.load %arg3[%c0_1, %c0_2] : memref<8x50xf32, #tpu.memory_space<vmem>>, vector<8x50xf32>
    %cst = arith.constant dense<0.000000e+00> : vector<32x8xf32>
    %2 = tpu.matmul %0, %1, %cst {dimension_numbers = #tpu.dot_dimension_numbers<[1], [1], [0], [0], [0, 0, 1, 0], [], []>} : vector<32x50xf32>, vector<8x50xf32>, vector<32x8xf32> -> vector<32x8xf32>
    %c0_3 = arith.constant 0 : index
    %c0_4 = arith.constant 0 : index
    %3 = vector.load %arg5[%c0_3, %c0_4] : memref<32x1xf32, #tpu.memory_space<vmem>>, vector<32x1xf32>
    %4 = vector.broadcast %3 : vector<32x1xf32> to vector<32x8xf32>
    %5 = arith.addf %2, %4 : vector<32x8xf32>
    %cst_5 = arith.constant 0.000000e+00 : f32
    %6 = vector.broadcast %cst_5 : f32 to vector<32x8xf32>
    %7 = arith.maximumf %5, %6 : vector<32x8xf32>
    %c0_6 = arith.constant 0 : index
    %c0_7 = arith.constant 0 : index
    %8 = vector.load %arg6[%c0_6, %c0_7] : memref<16x32xf32, #tpu.memory_space<vmem>>, vector<16x32xf32>
    %cst_8 = arith.constant dense<0.000000e+00> : vector<16x8xf32>
    %9 = tpu.matmul %8, %7, %cst_8 {dimension_numbers = #tpu.dot_dimension_numbers<[1], [0], [0], [1], [0, 0, 1, 1], [], []>} : vector<16x32xf32>, vector<32x8xf32>, vector<16x8xf32> -> vector<16x8xf32>
    %c0_9 = arith.constant 0 : index
    %c0_10 = arith.constant 0 : index
    %10 = vector.load %arg7[%c0_9, %c0_10] : memref<16x1xf32, #tpu.memory_space<vmem>>, vector<16x1xf32>
    %11 = vector.broadcast %10 : vector<16x1xf32> to vector<16x8xf32>
    %12 = arith.addf %9, %11 : vector<16x8xf32>
    %c0_11 = arith.constant 0 : index
    %c0_12 = arith.constant 0 : index
    %13 = memref.load %arg1[%c0_11, %c0_12] : memref<1x1xf32, #tpu.memory_space<smem>>
    %cst_13 = arith.constant 0.000000e+00 : f32
    %14 = vector.broadcast %cst_13 : f32 to vector<16x8xf32>
    %15 = arith.cmpf ogt, %12, %14 : vector<16x8xf32>
    %16 = vector.broadcast %13 : f32 to vector<16x8xf32>
    %17 = arith.mulf %16, %12 : vector<16x8xf32>
    %18 = arith.select %15, %12, %17 : vector<16x8xi1>, vector<16x8xf32>
    %c0_14 = arith.constant 0 : index
    %c0_15 = arith.constant 0 : index
    %19 = vector.load %arg8[%c0_14, %c0_15] : memref<16x1xf32, #tpu.memory_space<vmem>>, vector<16x1xf32>
    %20 = vector.broadcast %19 : vector<16x1xf32> to vector<16x8xf32>
    %21 = arith.mulf %20, %18 : vector<16x8xf32>
    %cst_16 = arith.constant dense<0.000000e+00> : vector<8xf32>
    %22 = vector.multi_reduction <add>, %21, %cst_16 [0] : vector<16x8xf32> to vector<8xf32>
    %23 = vector.shape_cast %22 : vector<8xf32> to vector<1x8xf32>
    %c0_17 = arith.constant 0 : index
    %c0_18 = arith.constant 0 : index
    %24 = memref.load %arg2[%c0_17, %c0_18] : memref<1x1xf32, #tpu.memory_space<smem>>
    %25 = vector.broadcast %24 : f32 to vector<1x8xf32>
    %26 = arith.addf %23, %25 : vector<1x8xf32>
    %27 = arith.negf %26 : vector<1x8xf32>
    %28 = math.exp %27 : vector<1x8xf32>
    %cst_19 = arith.constant 1.000000e+00 : f32
    %29 = vector.broadcast %cst_19 : f32 to vector<1x8xf32>
    %30 = arith.addf %29, %28 : vector<1x8xf32>
    %31 = arith.divf %29, %30 : vector<1x8xf32>
    %c0_20 = arith.constant 0 : index
    %c0_21 = arith.constant 0 : index
    %32 = vector.load %arg9[%c0_20, %c0_21] : memref<1x8xf32, #tpu.memory_space<vmem>>, vector<1x8xf32>
    tpu.vector_store %arg9[%c0_20, %c0_21], %31 {strides = array<i32>} : memref<1x8xf32, #tpu.memory_space<vmem>>, vector<1x8xf32>,
    return
  }
  func.func @transform_0(%arg0: i32) -> (i32, i32) {
    %c0_i32 = arith.constant 0 : i32
    %c0_i32_0 = arith.constant 0 : i32
    %c0_i32_1 = arith.constant 0 : i32
    return %c0_i32, %c0_i32_0 : i32, i32
  }
  func.func @transform_1(%arg0: i32) -> (i32, i32) {
    %c0_i32 = arith.constant 0 : i32
    %c0_i32_0 = arith.constant 0 : i32
    %c0_i32_1 = arith.constant 0 : i32
    return %c0_i32, %c0_i32_0 : i32, i32
  }
  func.func @transform_2(%arg0: i32) -> (i32, i32) {
    %c0_i32 = arith.constant 0 : i32
    %c0_i32_0 = arith.constant 0 : i32
    return %arg0, %c0_i32 : i32, i32
  }
  func.func @transform_3(%arg0: i32) -> (i32, i32) {
    %c0_i32 = arith.constant 0 : i32
    %c0_i32_0 = arith.constant 0 : i32
    %c0_i32_1 = arith.constant 0 : i32
    return %c0_i32, %c0_i32_0 : i32, i32
  }
  func.func @transform_4(%arg0: i32) -> (i32, i32) {
    %c0_i32 = arith.constant 0 : i32
    %c0_i32_0 = arith.constant 0 : i32
    %c0_i32_1 = arith.constant 0 : i32
    return %c0_i32, %c0_i32_0 : i32, i32
  }
  func.func @transform_5(%arg0: i32) -> (i32, i32) {
    %c0_i32 = arith.constant 0 : i32
    %c0_i32_0 = arith.constant 0 : i32
    %c0_i32_1 = arith.constant 0 : i32
    return %c0_i32, %c0_i32_0 : i32, i32
  }
  func.func @transform_6(%arg0: i32) -> (i32, i32) {
    %c0_i32 = arith.constant 0 : i32
    %c0_i32_0 = arith.constant 0 : i32
    %c0_i32_1 = arith.constant 0 : i32
    return %c0_i32, %c0_i32_0 : i32, i32
  }
  func.func @transform_7(%arg0: i32) -> (i32, i32) {
    %c0_i32 = arith.constant 0 : i32
    %c0_i32_0 = arith.constant 0 : i32
    %c0_i32_1 = arith.constant 0 : i32
    return %c0_i32, %c0_i32_0 : i32, i32
  }
  func.func @transform_8(%arg0: i32) -> (i32, i32) {
    %c0_i32 = arith.constant 0 : i32
    %c0_i32_0 = arith.constant 0 : i32
    return %c0_i32, %arg0 : i32, i32
  }
}

</mosaic_0001>

<bundles_post_ra>
// kernel: tpu_custom_call.1
= control target key start
LH: loop header
LB: loop body
LE: loop exit
PB: predicated region body
PF: predicated region fallthrough
CT: control target
= control target key end

     0   :  { %vm61_vm0 = vcmask 408576   ;;  %v397_v4 = vmov 0   ;;  %s515_s0 = inlined_call_operand.<no memory space> [shape: f32[1,1], index: 0, kind: input, shape index: {}]   ;;  %s516_s1 = inlined_call_operand.<no memory space> [shape: f32[1,1], index: 1, kind: input, shape index: {}]   ;;  %s517_s2 = inlined_call_operand.vmem [shape: f32[8,50], index: 2, kind: input, shape index: {}]   ;;  %s518_s3 = inlined_call_operand.vmem [shape: f32[32,50], index: 3, kind: input, shape index: {}]   ;;  %s519_s4 = inlined_call_operand.vmem [shape: f32[32,1], index: 4, kind: input, shape index: {}]   ;;  %s520_s5 = inlined_call_operand.vmem [shape: f32[16,32], index: 5, kind: input, shape index: {}]   ;;  %s521_s6 = inlined_call_operand.vmem [shape: f32[16,1], index: 6, kind: input, shape index: {}]   ;;  %s522_s7 = inlined_call_operand.vmem [shape: f32[16,1], index: 7, kind: input, shape index: {}]   ;;  %s523_s8 = inlined_call_operand.hbm [shape: f32[1,8], index: 8, kind: output, shape index: {}]  }
   0x1   :  { %v36_v0 = vld [vmem:[%s517_s2] sm:$0xff]  ;;  %v33_v3 = vld [vmem:[%s518_s3 + $0x8] sm:$0xff]  ;;  %367 = vset.pattern.permute.xlu0 %v397_v4  ;;  %v39_v5 = vld [vmem:[%s519_s4 + $0x10] sm:$0xff]  ;;  %368 = vset.pattern.permute.xlu1 %v397_v4 }
   0x2   :  { %v32_v1 = vld [vmem:[%s518_s3] sm:$0xff]  ;;  %338 = vmatprep.subr.msk.mxu0 %vm61_vm0, %v36_v0  ;;  %v34_v6 = vld [vmem:[%s518_s3 + $0x10] sm:$0xff]  ;;  %53 = vperm.xlu1 %368, %v39_v5   ;;  %v38_v7 = vld [vmem:[%s519_s4 + $0x8] sm:$0xff] }
   0x3   :  { %340 = vmatprep.mubr.msk.f32.mxu0 %vm61_vm0, %v32_v1  ;;  %v37_v2 = vld [vmem:[%s519_s4] sm:$0xff]  ;;  %339 = vmatpush3.xpose.msk.msra.mxu0 %vm61_vm0, %v36_v0 }
   0x4   :  { %43 = vperm.xlu0 %367, %v37_v2  }
   0x5   :  { %15 = vsyncpa [#allocation5], 0  ;;  %v40_v8 = vld [vmem:[%s519_s4 + $0x18] sm:$0xff]  ;;  %v168_v10 = vld [vmem:[%s521_s6] sm:$0xff]  ;;  %vm180_vm1 = vcmask 261120   ;;  %v265_v37 = vstv %s515_s0  ;;  %vm284_vm4 = vcmask 64512   ;;  %v295_v57 = vstv %s516_s1 }
   0x6   :  { %341 = vmatmul.mubr.msk.f32.vlgmr.msra.gmra.mrb[0].mxu0 %vm61_vm0, %v33_v3  ;;  %v35_v9 = vld [vmem:[%s518_s3 + $0x18] sm:$0xff]  ;;  %58 = vperm.xlu1 %368, %v40_v8   ;;  %v169_v11 = vld [vmem:[%s521_s6 + $0x8] sm:$0xff]  ;;  %v270_v12 = vld [vmem:[%s522_s7] sm:$0xff]  ;;  %s398_s10 = smov [#allocation4]   ;;  %vm303_vm5 = vcmask 57344  }
   0x7   :  { %343 = vmatprep.mubr.msk.f32.mxu0 %vm61_vm0, %v34_v6  ;;  %v271_v13 = vld [vmem:[%s522_s7 + $0x8] sm:$0xff]  ;;  %v166_v14 = vld [vmem:[%s520_s5] sm:$0xff]  ;;  %s311_s11 = sshll.u32 %s398_s10, 4  ;;  %s312_s11 = int_to_ptr.vmem [resolvable:$true] %s311_s11 }
   0x8   :  { %48 = vperm.xlu0 %367, %v38_v7   ;;  %354 = vmatprep.mubr.msk.f32.mxu1 %vm180_vm1, %v166_v14  ;;  %v167_v33 = vld [vmem:[%s520_s5 + $0x8] sm:$0xff]  ;;  %s373_s12 = scalar_lea.vmem %s312_s11, 16  ;;  %s377_s2 = scalar_lea.vmem %s312_s11, 32 }
   0x9   :  { %p374_p0 = scmp.ne.s32.totalorder %s312_s11, %s373_s12  ;;  %p378_p1 = scmp.lt.s32.totalorder %s312_s11, %s312_s11 }
   0xa   :  { %344 = vmatmul.mubr.msk.f32.gmra.mrb[2].mxu0 %vm61_vm0, %v35_v9  ;;  %177 = vperm.xlu1 %368, %v169_v11   ;;  %p379_p2 = scmp.lt.s32.totalorder %s377_s2, %s373_s12 }
   0xc   :  { %172 = vperm.xlu0 %367, %v168_v10   ;;  %p380_p3 = por %p379_p2, %p378_p1 }
   0xe   :  { %279 = vperm.xlu1 %368, %v271_v13   ;;  %p381_p4 = pnand %p380_p3, %p374_p0 }
  0x10   :  { %274 = vperm.xlu0 %367, %v270_v12  }
  0x81   :  { %v54_v16 = vpop.permute.xlu1 %53 }
  0x83   :  { %v44_v15 = vpop.permute.xlu0 %43 }
  0x85   :  { %v59_v23 = vpop.permute.xlu1 %58 }
  0x87   :  { %v49_v17 = vpop.permute.xlu0 %48 }
  0x89   :  { %v178_v34 = vpop.permute.xlu1 %177 }
  0x8b   :  { %v173_v35 = vpop.permute.xlu0 %172 }
  0x8d   :  { %v280_v43 = vpop.permute.xlu1 %279 }
  0x8f   :  { %v275_v45 = vpop.permute.xlu0 %274 }
  0xd9   :  { %v342_v18 = vpop.f32.mrb[0].mxu0 }
  0xda   :  { %v149_v19 = vadd.f32 %v342_v18, %v49_v17  ;;  %v143_v20 = vpop.f32.mrb[1].mxu0 }
  0xdb   :  { %v144_v21 = vadd.f32 %v143_v20, %v44_v15 }
  0xdc   :  { %v163_v22 = vmax.f32 %v149_v19, 0.0 }
  0xdd   :  { %v162_v24 = vmax.f32 %v144_v21, 0.0  ;;  %v345_v25 = vpop.f32.mrb[2].mxu0 }
  0xde   :  { %v159_v26 = vadd.f32 %v345_v25, %v59_v23  ;;  %v153_v27 = vpop.f32.mrb[3].mxu0 }
  0xdf   :  { %v154_v28 = vadd.f32 %v153_v27, %v54_v16  ;;  %v357_v29 = vpack.c.bf16 %v163_v22, %v162_v24 }
  0xe0   :  { %v165_v30 = vmax.f32 %v159_v26, 0.0 }
  0xe1   :  { %v164_v31 = vmax.f32 %v154_v28, 0.0  ;;  %358 = vmatprep.subr.bf16.mxu1 %v357_v29 }
  0xe2   :  { %360 = vmatpush3.bf16.msra.mxu1 %v357_v29 }
  0xe3   :  { %v361_v32 = vpack.c.bf16 %v165_v30, %v164_v31 }
  0xe5   :  { %362 = vmatprep.subr.bf16.mxu1 %v361_v32 }
  0xe6   :  { %364 = vmatpush3.bf16.msra.mxu1 %v361_v32 }
  0xe9   :  { %355 = vmatmul.mubr.msk.f32.vlgmr.msra.gmra.mrb[0].mxu1 %vm180_vm1, %v167_v33 }
 0x1bc   :  { %v356_v36 = vpop.f32.mrb[0].mxu1 }
 0x1bd   :  { %v259_v38 = vadd.f32 %v356_v36, %v178_v34  ;;  %v253_v39 = vpop.f32.mrb[1].mxu1 }
 0x1be   :  { %v254_v40 = vadd.f32 %v253_v39, %v173_v35 }
 0x1bf   :  { %vm264_vm2 = vcmp.gt.f32.partialorder %v259_v38, 0.0  ;;  %v267_v41 = vmul.f32 %v265_v37, %v259_v38 }
 0x1c0   :  { %vm263_vm3 = vcmp.gt.f32.partialorder %v254_v40, 0.0  ;;  %v266_v42 = vmul.f32 %v265_v37, %v254_v40 }
 0x1c1   :  { %v269_v44 = vsel %vm264_vm2, %v259_v38, %v267_v41 }
 0x1c2   :  { %v283_v46 = vmul.f32 %v280_v43, %v269_v44  ;;  %v268_v47 = vsel %vm263_vm3, %v254_v40, %v266_v42 }
 0x1c3   :  { %v282_v48 = vmul.f32 %v275_v45, %v268_v47 }
 0x1c4   :  { %v286_v49 = vsel %vm284_vm4, %v283_v46, 0.0 }
 0x1c5   :  { %v285_v50 = vsel %vm284_vm4, %v282_v48, 0.0 }
 0x1c6   :  { %v287_v51 = vadd.f32 %v286_v49, %v285_v50 }
 0x1c8   :  { %v288_v52 = vrot.slane %v287_v51, 4 }
 0x1ca   :  { %v289_v53 = vadd.f32 %v288_v52, %v287_v51 }
 0x1cc   :  { %v290_v54 = vrot.slane %v289_v53, 2 }
 0x1ce   :  { %v291_v55 = vadd.f32 %v290_v54, %v289_v53 }
 0x1d0   :  { %v292_v56 = vrot.slane %v291_v55, 1 }
 0x1d2   :  { %v293_v58 = vadd.f32 %v292_v56, %v291_v55 }
 0x1d4   :  { %v296_v59 = vadd.f32 %v295_v57, %v293_v58 }
 0x1d6   :  { %v326_v60 = vmul.f32 -1.442695, %v296_v59 }
 0x1d8   :  { %369 = vpow2.f32 %v326_v60 }
 0x1e2   :  { %v370_v61 = vpop.eup %369 }
 0x1e3   :  { %v300_v62 = vadd.f32 1.0, %v370_v61 }
 0x1e5   :  { %371 = vrcp.f32 %v300_v62 }
 0x1ef   :  { %v372_v63 = vpop.eup %371 }
 0x1f0   :  { %304 = vst.msk [vmem:[#allocation4] sm:$0x1] %vm303_vm5, %v372_v63 }
 0x1f1   :  { %384 = shalt.err (!%p381_p4)
}
 0x1f2   :  { %s385_s14 = scalar_lea.hbm %s523_s8, 16 }
 0x1f3   :  { %p386_p5 = scmp.ne.s32.totalorder %s523_s8, %s385_s14  ;;  %p389_p6 = scmp.lt.u32.totalorder %s385_s14, %s523_s8 }
 0x1f5   :  { %p391_p7 = pnand %p389_p6, %p386_p5 }
 0x1f7   :  { %394 = shalt.err (!%p391_p7)
}
 0x1f8   :  { %314 = dma.vmem_to_hbm [thread:$0]  %s312_s11, 16, %s523_s8, [#allocation5]  }
 0x1f9   :  { %395 = dma.done.wait [#allocation5], 16  }
 0x1fa   :  { %396 = vsyncadd [#allocation5], 4294967280 }
 0x1fb   :  { %318 = vsyncpa [#allocation5], 1 }

</bundles_post_ra>
